<compile_context>
chip_gen: v6e
topology: v6e:2x2x1
jax: 0.10.0
libtpu: 0.0.40
codegen_flags: <defaults>
</compile_context>

<pallas_src>
import math

import jax
import jax.numpy as jnp
from jax.experimental import pallas as pl
from jax.experimental.pallas import tpu as pltpu


def _round_up(x: int, m: int) -> int:
    return (x + m - 1) // m * m


def _pick_block(extent: int, requested: int, align: int) -> int:
    """Block size (multiple of `align`) minimizing padding for `extent`."""
    extent_a = _round_up(extent, align)
    requested = max(align, _round_up(min(requested, extent_a), align))
    n_tiles = pl.cdiv(extent_a, requested)
    return _round_up(pl.cdiv(extent_a, n_tiles), align)


def ffn_kernel(x_ref, w1_ref, b1_ref, w2_ref, b2_ref, o_ref, acc_ref):
    """One (block_m, block_ff) step of y = relu(x@w1+b1) @ w2 + b2.

    Grid = (M tiles, ff tiles).  ff is the reduction axis: acc_ref (f32, VMEM)
    is zeroed at k == 0 and written out (plus b2) at the last k.
    """
    k = pl.program_id(1)

    @pl.when(k == 0)
    def _init():
        acc_ref[...] = jnp.zeros_like(acc_ref)

    # (block_m, d_pad) @ (d_pad, block_ff) -> f32 on the MXU
    h = jnp.dot(x_ref[...], w1_ref[...], preferred_element_type=jnp.float32)
    h = jnp.maximum(h + b1_ref[...], 0.0)          # bias + ReLU on the VPU
    # dropout == identity (eval / inference mode)

    # (block_m, block_ff) @ (block_ff, d_pad) -> accumulate in f32
    acc_ref[...] += jnp.dot(h.astype(w2_ref.dtype), w2_ref[...],
                            preferred_element_type=jnp.float32)

    @pl.when(k == pl.num_programs(1) - 1)
    def _finalize():
        # b2 added exactly once, at the end of the reduction.
        o_ref[...] = (acc_ref[...] + b2_ref[...]).astype(o_ref.dtype)


def feed_forward(x, w1, b1, w2, b2, *, block_m=512, block_ff=1024):
    """x: (batch, seq, d_model) -> (batch, seq, d_model).

    Weights are stored pre-transposed relative to torch's (out, in):
      w1: (d_model, ff_dim), b1: (1, ff_dim)
      w2: (ff_dim, d_model), b2: (1, d_model)
    For bf16 MXU operands, pass bf16 weights (x is cast to match); accumulation
    stays in f32.
    """
    batch, seq, d_model = x.shape
    ff_dim = w1.shape[1]
    M = batch * seq

    # ---- lane/sublane-friendly padding & waste-minimizing tile choice ----
    d_pad = _round_up(d_model, 128)                 # lane-dense output
    block_ff = _pick_block(ff_dim, block_ff, 128)
    ff_pad = _round_up(ff_dim, block_ff)            # reduction axis tiles exactly
    block_m = _pick_block(M, block_m, 8)
    m_pad = _round_up(M, block_m)

    x2 = x.reshape(M, d_model)
    x2 = jnp.pad(x2, ((0, m_pad - M), (0, d_pad - d_model)))
    w1p = jnp.pad(w1, ((0, d_pad - d_model), (0, ff_pad - ff_dim)))
    b1p = jnp.pad(b1, ((0, 0), (0, ff_pad - ff_dim)))
    w2p = jnp.pad(w2, ((0, ff_pad - ff_dim), (0, d_pad - d_model)))
    b2p = jnp.pad(b2, ((0, 0), (0, d_pad - d_model)))
    x2 = x2.astype(w1p.dtype)                       # match MXU operand dtype to weights

    grid = (m_pad // block_m, ff_pad // block_ff)

    # ---- VMEM budget for the chosen tiles (double-buffered by BlockSpec) ----
    it_w = jnp.dtype(w1p.dtype).itemsize
    it_x = jnp.dtype(x2.dtype).itemsize
    it_o = jnp.dtype(x.dtype).itemsize
    tile_bytes = 2 * (block_m * d_pad * it_x        # x tile
                      + d_pad * block_ff * it_w     # w1 panel
                      + block_ff * it_w             # b1 slice
                      + block_ff * d_pad * it_w     # w2 panel
                      + d_pad * it_w                # b2
                      + block_m * d_pad * it_o)     # out tile
    tile_bytes += block_m * d_pad * 4               # f32 accumulator
    # NOTE: on v7x (64 MiB VMEM/TC) pick block_m/block_ff so tile_bytes <~ 48 MiB.
    vmem_limit = int(min(max(tile_bytes + (8 << 20), 32 << 20), 112 << 20))

    flops = 4 * m_pad * d_pad * ff_pad              # two matmuls, 2 flops/MAC
    bytes_accessed = int(x2.size * it_x
                         + (w1p.size + b1p.size + w2p.size + b2p.size) * it_w
                         + m_pad * d_pad * it_o)
    cost = pl.CostEstimate(flops=flops, transcendentals=0,
                           bytes_accessed=bytes_accessed)

    out = pl.pallas_call(
        ffn_kernel,
        out_shape=jax.ShapeDtypeStruct((m_pad, d_pad), x.dtype),
        grid_spec=pltpu.PrefetchScalarGridSpec(
            num_scalar_prefetch=0,
            grid=grid,
            in_specs=[
                pl.BlockSpec((block_m, d_pad), lambda i, k: (i, 0)),   # x tile
                pl.BlockSpec((d_pad, block_ff), lambda i, k: (0, k)),  # w1 panel
                pl.BlockSpec((1, block_ff), lambda i, k: (0, k)),      # b1 slice
                pl.BlockSpec((block_ff, d_pad), lambda i, k: (k, 0)),  # w2 panel
                pl.BlockSpec((1, d_pad), lambda i, k: (0, 0)),         # b2
            ],
            out_specs=pl.BlockSpec((block_m, d_pad), lambda i, k: (i, 0)),
            scratch_shapes=[pltpu.VMEM((block_m, d_pad), jnp.float32)],
        ),
        compiler_params=pltpu.CompilerParams(
            dimension_semantics=("parallel", "arbitrary"),
            vmem_limit_bytes=vmem_limit,
        ),
        cost_estimate=cost,
    )(x2, w1p, b1p, w2p, b2p)

    return out[:M, :d_model].reshape(batch, seq, d_model)


def init_params(key, d_model, ff_dim, dtype=jnp.float32):
    """Deterministic init mimicking nn.Linear's U(-1/sqrt(fan_in), 1/sqrt(fan_in))."""
    k1, k2, k3, k4 = jax.random.split(key, 4)
    b1v = 1.0 / math.sqrt(d_model)
    b2v = 1.0 / math.sqrt(ff_dim)
    w1 = jax.random.uniform(k1, (d_model, ff_dim), dtype, -b1v, b1v)
    b1 = jax.random.uniform(k2, (1, ff_dim), dtype, -b1v, b1v)
    w2 = jax.random.uniform(k3, (ff_dim, d_model), dtype, -b2v, b2v)
    b2 = jax.random.uniform(k4, (1, d_model), dtype, -b2v, b2v)
    return w1, b1, w2, b2


def _reference(x, w1, b1, w2, b2):
    bsz, seq, d_model = x.shape
    x2 = x.reshape(-1, d_model).astype(jnp.float32)
    h = jnp.maximum(x2 @ w1.astype(jnp.float32) + b1.astype(jnp.float32), 0.0)
    y = h @ w2.astype(jnp.float32) + b2.astype(jnp.float32)
    return y.reshape(bsz, seq, d_model)


if __name__ == "__main__":
    key = jax.random.PRNGKey(0)
    k1, k2, k3, k4, k5, k6 = jax.random.split(key, 6)

    # ---- test 1: small shapes (exercise lane padding 32->128, 64->128) ----
    batch, seq, d_model, ff_dim = 2, 8, 32, 64
    x = jax.random.normal(k1, (batch, seq, d_model), jnp.float32)
    w1, b1, w2, b2 = init_params(k2, d_model, ff_dim, jnp.float32)
    y = jax.block_until_ready(feed_forward(x, w1, b1, w2, b2))
    ref = _reference(x, w1, b1, w2, b2)
    assert y.shape == (batch, seq, d_model)
    assert jnp.allclose(y, ref, atol=1e-5, rtol=1e-5)

    # ---- test 2: multi-block grid (M tiles + ff reduction tiles, partial M) ----
    batch, seq, d_model, ff_dim = 2, 136, 128, 384     # M=272 -> 2 tiles of 136
    x = jax.random.normal(k3, (batch, seq, d_model), jnp.float32)
    w1, b1, w2, b2 = init_params(k4, d_model, ff_dim, jnp.float32)
    y = jax.block_until_ready(
        feed_forward(x, w1, b1, w2, b2, block_m=128, block_ff=128))
    ref = _reference(x, w1, b1, w2, b2)
    assert jnp.allclose(y, ref, atol=1e-4, rtol=1e-4)

    # ---- test 3: bf16 weights (bf16 MXU operands, f32 accumulation) ----
    batch, seq, d_model, ff_dim = 2, 64, 128, 256
    x = jax.random.normal(k5, (batch, seq, d_model), jnp.float32)
    w1, b1, w2, b2 = init_params(k6, d_model, ff_dim, jnp.bfloat16)
    y = jax.block_until_ready(
        feed_forward(x, w1, b1, w2, b2, block_m=128, block_ff=128))
    ref = _reference(x, w1, b1, w2, b2)
    assert jnp.allclose(y.astype(jnp.float32), ref, atol=5e-2, rtol=5e-2)

    print("KERNEL_OK")
</pallas_src>

<mosaic_0001>
module attributes {stable_mosaic.version = 11 : i64} {
  func.func @ffn_kernel(%arg0: i32, %arg1: i32, %arg2: memref<16x128xf32, #tpu.memory_space<vmem>>, %arg3: memref<128x128xf32, #tpu.memory_space<vmem>>, %arg4: memref<1x128xf32, #tpu.memory_space<vmem>>, %arg5: memref<128x128xf32, #tpu.memory_space<vmem>>, %arg6: memref<1x128xf32, #tpu.memory_space<vmem>>, %arg7: memref<16x128xf32, #tpu.memory_space<vmem>>, %arg8: memref<16x128xf32, #tpu.memory_space<vmem>>) attributes {dimension_semantics = [#tpu.dimension_semantics<parallel>, #tpu.dimension_semantics<arbitrary>], iteration_bounds = array<i64: 1, 1>, scalar_prefetch = 0 : i64, scratch_operands = 1 : i64, tpu.core_type = #tpu.core_type<tc>, window_params = [{transform_indices = @transform_0, window_bounds = array<i64: 16, 128>}, {transform_indices = @transform_1, window_bounds = array<i64: 128, 128>}, {transform_indices = @transform_2, window_bounds = array<i64: 1, 128>}, {transform_indices = @transform_3, window_bounds = array<i64: 128, 128>}, {pipeline_mode = #tpu.pipeline_mode<synchronous>, transform_indices = @transform_4, window_bounds = array<i64: 1, 128>}, {transform_indices = @transform_5, window_bounds = array<i64: 16, 128>}]} {
    %c0_i32 = arith.constant 0 : i32
    %0 = arith.cmpi eq, %arg1, %c0_i32 : i32
    %1 = arith.extui %0 : i1 to i32
    %c0_i32_0 = arith.constant 0 : i32
    %2 = arith.cmpi ne, %1, %c0_i32_0 : i32
    scf.if %2 {
      %cst_16 = arith.constant 0.000000e+00 : f32
      %19 = vector.broadcast %cst_16 : f32 to vector<16x128xf32>
      %c0_17 = arith.constant 0 : index
      %c0_18 = arith.constant 0 : index
      %20 = vector.load %arg8[%c0_17, %c0_18] : memref<16x128xf32, #tpu.memory_space<vmem>>, vector<16x128xf32>
      tpu.vector_store %arg8[%c0_17, %c0_18], %19 {strides = array<i32>} : memref<16x128xf32, #tpu.memory_space<vmem>>, vector<16x128xf32>,
    } else {
    }
    %c0 = arith.constant 0 : index
    %c0_1 = arith.constant 0 : index
    %3 = vector.load %arg2[%c0, %c0_1] : memref<16x128xf32, #tpu.memory_space<vmem>>, vector<16x128xf32>
    %c0_2 = arith.constant 0 : index
    %c0_3 = arith.constant 0 : index
    %4 = vector.load %arg3[%c0_2, %c0_3] : memref<128x128xf32, #tpu.memory_space<vmem>>, vector<128x128xf32>
    %cst = arith.constant dense<0.000000e+00> : vector<16x128xf32>
    %5 = tpu.matmul %3, %4, %cst {dimension_numbers = #tpu.dot_dimension_numbers<[1], [0], [0], [1], [0, 0, 1, 1], [], []>} : vector<16x128xf32>, vector<128x128xf32>, vector<16x128xf32> -> vector<16x128xf32>
    %c0_4 = arith.constant 0 : index
    %c0_5 = arith.constant 0 : index
    %6 = vector.load %arg4[%c0_4, %c0_5] : memref<1x128xf32, #tpu.memory_space<vmem>>, vector<1x128xf32>
    %7 = vector.broadcast %6 : vector<1x128xf32> to vector<16x128xf32>
    %8 = arith.addf %5, %7 : vector<16x128xf32>
    %cst_6 = arith.constant 0.000000e+00 : f32
    %9 = vector.broadcast %cst_6 : f32 to vector<16x128xf32>
    %10 = arith.maximumf %8, %9 : vector<16x128xf32>
    %c0_7 = arith.constant 0 : index
    %c0_8 = arith.constant 0 : index
    %11 = vector.load %arg8[%c0_7, %c0_8] : memref<16x128xf32, #tpu.memory_space<vmem>>, vector<16x128xf32>
    %c0_9 = arith.constant 0 : index
    %c0_10 = arith.constant 0 : index
    %12 = vector.load %arg5[%c0_9, %c0_10] : memref<128x128xf32, #tpu.memory_space<vmem>>, vector<128x128xf32>
    %cst_11 = arith.constant dense<0.000000e+00> : vector<16x128xf32>
    %13 = tpu.matmul %10, %12, %cst_11 {dimension_numbers = #tpu.dot_dimension_numbers<[1], [0], [0], [1], [0, 0, 1, 1], [], []>} : vector<16x128xf32>, vector<128x128xf32>, vector<16x128xf32> -> vector<16x128xf32>
    %14 = arith.addf %11, %13 : vector<16x128xf32>
    %c0_12 = arith.constant 0 : index
    %c0_13 = arith.constant 0 : index
    %15 = vector.load %arg8[%c0_12, %c0_13] : memref<16x128xf32, #tpu.memory_space<vmem>>, vector<16x128xf32>
    tpu.vector_store %arg8[%c0_12, %c0_13], %14 {strides = array<i32>} : memref<16x128xf32, #tpu.memory_space<vmem>>, vector<16x128xf32>,
    %c0_i32_14 = arith.constant 0 : i32
    %16 = arith.cmpi eq, %arg1, %c0_i32_14 : i32
    %17 = arith.extui %16 : i1 to i32
    %c0_i32_15 = arith.constant 0 : i32
    %18 = arith.cmpi ne, %17, %c0_i32_15 : i32
    scf.if %18 {
      %c0_16 = arith.constant 0 : index
      %c0_17 = arith.constant 0 : index
      %19 = vector.load %arg8[%c0_16, %c0_17] : memref<16x128xf32, #tpu.memory_space<vmem>>, vector<16x128xf32>
      %c0_18 = arith.constant 0 : index
      %c0_19 = arith.constant 0 : index
      %20 = vector.load %arg6[%c0_18, %c0_19] : memref<1x128xf32, #tpu.memory_space<vmem>>, vector<1x128xf32>
      %21 = vector.broadcast %20 : vector<1x128xf32> to vector<16x128xf32>
      %22 = arith.addf %19, %21 : vector<16x128xf32>
      %c0_20 = arith.constant 0 : index
      %c0_21 = arith.constant 0 : index
      %23 = vector.load %arg7[%c0_20, %c0_21] : memref<16x128xf32, #tpu.memory_space<vmem>>, vector<16x128xf32>
      tpu.vector_store %arg7[%c0_20, %c0_21], %22 {strides = array<i32>} : memref<16x128xf32, #tpu.memory_space<vmem>>, vector<16x128xf32>,
    } else {
    }
    return
  }
  func.func @transform_0(%arg0: i32, %arg1: i32) -> (i32, i32) {
    %c0_i32 = arith.constant 0 : i32
    %c0_i32_0 = arith.constant 0 : i32
    return %arg0, %c0_i32 : i32, i32
  }
  func.func @transform_1(%arg0: i32, %arg1: i32) -> (i32, i32) {
    %c0_i32 = arith.constant 0 : i32
    %c0_i32_0 = arith.constant 0 : i32
    return %c0_i32, %arg1 : i32, i32
  }
  func.func @transform_2(%arg0: i32, %arg1: i32) -> (i32, i32) {
    %c0_i32 = arith.constant 0 : i32
    %c0_i32_0 = arith.constant 0 : i32
    return %c0_i32, %arg1 : i32, i32
  }
  func.func @transform_3(%arg0: i32, %arg1: i32) -> (i32, i32) {
    %c0_i32 = arith.constant 0 : i32
    %c0_i32_0 = arith.constant 0 : i32
    return %arg1, %c0_i32 : i32, i32
  }
  func.func @transform_4(%arg0: i32, %arg1: i32) -> (i32, i32) {
    %c0_i32 = arith.constant 0 : i32
    %c0_i32_0 = arith.constant 0 : i32
    %c0_i32_1 = arith.constant 0 : i32
    return %c0_i32, %c0_i32_0 : i32, i32
  }
  func.func @transform_5(%arg0: i32, %arg1: i32) -> (i32, i32) {
    %c0_i32 = arith.constant 0 : i32
    %c0_i32_0 = arith.constant 0 : i32
    return %arg0, %c0_i32 : i32, i32
  }
}

</mosaic_0001>

<bundles_post_ra>
// kernel: tpu_custom_call.1
= control target key start
LH: loop header
LB: loop body
LE: loop exit
PB: predicated region body
PF: predicated region fallthrough
CT: control target
= control target key end

     0   :  { %10 = vsyncpa [#allocation4], 0  ;;  %s567_s0 = inlined_call_operand.hbm [shape: f32[16,128], index: 0, kind: input, shape index: {}]   ;;  %s568_s1 = inlined_call_operand.hbm [shape: f32[128,128], index: 1, kind: input, shape index: {}]   ;;  %s569_s2 = inlined_call_operand.vmem [shape: f32[1,128], index: 2, kind: input, shape index: {}]   ;;  %s570_s3 = inlined_call_operand.hbm [shape: f32[128,128], index: 3, kind: input, shape index: {}]   ;;  %s571_s4 = inlined_call_operand.vmem [shape: f32[1,128], index: 4, kind: input, shape index: {}]   ;;  %s572_s5 = inlined_call_operand.hbm [shape: f32[16,128], index: 5, kind: output, shape index: {}]  }
   0x1   :  { %11 = vsyncpa [#allocation7], 0 }
   0x2   :  { %12 = vsyncpa [#allocation5], 0  ;;  %s501_s18 = smov [#allocation6]   ;;  %s502_s20 = smov [#allocation3]  }
   0x3   :  { %s30_s19 = sshll.u32 %s501_s18, 4  ;;  %s18_s21 = sshll.u32 %s502_s20, 4  ;;  %s31_s19 = int_to_ptr.vmem [resolvable:$true] %s30_s19  ;;  %s19_s21 = int_to_ptr.vmem [resolvable:$true] %s18_s21 }
   0x4   :  { %s423_s22 = scalar_lea.vmem %s31_s19, 2048  ;;  %p428_p1 = scmp.lt.s32.totalorder %s31_s19, %s31_s19 }
   0x5   :  { %p424_p0 = scmp.ne.s32.totalorder %s31_s19, %s423_s22  ;;  %p429_p2 = scmp.lt.s32.totalorder %s423_s22, %s423_s22 }
   0x7   :  { %p430_p3 = por %p429_p2, %p428_p1 }
   0x9   :  { %p431_p4 = pnand %p430_p3, %p424_p0 }
   0xb   :  { %434 = shalt.err (!%p431_p4)
}
   0xc   :  { %s503_s23 = smov 128   ;;  %s504_s24 = smov 8  }
   0xd   :  { %36 = dma.hbm_to_vmem [thread:$0]  %s568_s1, 2048, %s31_s19, [#allocation7], %s503_s23, %s503_s23, %s504_s24  }
   0xe   :  { %s443_s27 = scalar_lea.vmem %s19_s21, 256  ;;  %p448_p6 = scmp.lt.s32.totalorder %s19_s21, %s19_s21 }
   0xf   :  { %p444_p5 = scmp.ne.s32.totalorder %s19_s21, %s443_s27  ;;  %p449_p7 = scmp.lt.s32.totalorder %s443_s27, %s443_s27 }
  0x11   :  { %p450_p8 = por %p449_p7, %p448_p6 }
  0x13   :  { %p451_p9 = pnand %p450_p8, %p444_p5 }
  0x15   :  { %454 = shalt.err (!%p451_p9)
}
  0x16   :  { %24 = dma.hbm_to_vmem [thread:$0]  %s567_s0, 256, %s19_s21, [#allocation4], %s503_s23, %s503_s23, %s504_s24  }
  0x17   :  { %s505_s30 = smov [#allocation8]  }
  0x18   :  { %s44_s6 = sshll.u32 %s505_s30, 4  ;;  %s45_s6 = int_to_ptr.vmem [resolvable:$true] %s44_s6 }
  0x19   :  { %s463_s7 = scalar_lea.vmem %s45_s6, 2048  ;;  %p468_p11 = scmp.lt.s32.totalorder %s45_s6, %s45_s6 }
  0x1a   :  { %p464_p10 = scmp.ne.s32.totalorder %s45_s6, %s463_s7  ;;  %p469_p12 = scmp.lt.s32.totalorder %s463_s7, %s463_s7 }
  0x1c   :  { %p470_p13 = por %p469_p12, %p468_p11 }
  0x1e   :  { %p471_p0 = pnand %p470_p13, %p464_p10 }
  0x20   :  { %474 = shalt.err (!%p471_p0)
}
  0x21   :  { %50 = dma.hbm_to_vmem [thread:$0]  %s570_s3, 2048, %s45_s6, [#allocation7], %s503_s23, %s503_s23, %s504_s24  }
  0x22   :  { %495 = dma.done.wait [#allocation4], 256  }
  0x23   :  { %496 = vsyncadd [#allocation4], 4294967040 }
  0x24   :  { %497 = dma.done.wait [#allocation7], 4096  }
  0x25   :  { %498 = vsyncadd [#allocation7], 4294963200  ;;  %v85_v0 = vld [vmem:[#allocation6 + $0x78] sm:$0xff]  ;;  %v84_v1 = vld [vmem:[#allocation6 + $0x70] sm:$0xff]  ;;  %s506_s11 = smov [#allocation9]  }
  0x26   :  { %339 = vmatprep.subr.mxu0 %v85_v0  ;;  %v83_v2 = vld [vmem:[#allocation6 + $0x68] sm:$0xff]  ;;  %v82_v3 = vld [vmem:[#allocation6 + $0x60] sm:$0xff]  ;;  %v68_v4 = vld [vmem:[#allocation3] sm:$0xff]  ;;  %s288_s12 = sshll.u32 %s506_s11, 4  ;;  %s289_s12 = int_to_ptr.vmem [resolvable:$true] %s288_s12 }
  0x27   :  { %340 = vmatpush3.msra.mxu0 %v85_v0  ;;  %v81_v5 = vld [vmem:[#allocation6 + $0x58] sm:$0xff]  ;;  %371 = vmatprep.mubr.f32.mxu0 %v68_v4  ;;  %v186_v7 = vld [vmem:[#allocation8 + $0x70] sm:$0xff]  ;;  %v185_v9 = vld [vmem:[#allocation8 + $0x68] sm:$0xff]  ;;  %p480_p2 = scmp.lt.s32.totalorder %s289_s12, %s289_s12 }
  0x28   :  { %341 = vmatprep.subr.mxu0 %v84_v1  ;;  %v187_v6 = vld [vmem:[#allocation8 + $0x78] sm:$0xff]  ;;  %v80_v8 = vld [vmem:[#allocation6 + $0x50] sm:$0xff]  ;;  %v79_v10 = vld [vmem:[#allocation6 + $0x48] sm:$0xff] }
  0x29   :  { %342 = vmatpush3.msra.mxu0 %v84_v1  ;;  %374 = vmatprep.subr.mxu1 %v187_v6  ;;  %v184_v11 = vld [vmem:[#allocation8 + $0x60] sm:$0xff]  ;;  %v183_v13 = vld [vmem:[#allocation8 + $0x58] sm:$0xff]  ;;  %v182_v15 = vld [vmem:[#allocation8 + $0x50] sm:$0xff] }
  0x2a   :  { %343 = vmatprep.subr.mxu0 %v83_v2  ;;  %375 = vmatpush3.msra.mxu1 %v187_v6  ;;  %v78_v12 = vld [vmem:[#allocation6 + $0x40] sm:$0xff]  ;;  %v77_v14 = vld [vmem:[#allocation6 + $0x38] sm:$0xff]  ;;  %v76_v16 = vld [vmem:[#allocation6 + $0x30] sm:$0xff] }
  0x2b   :  { %344 = vmatpush3.msra.mxu0 %v83_v2  ;;  %376 = vmatprep.subr.mxu1 %v186_v7  ;;  %v181_v17 = vld [vmem:[#allocation8 + $0x48] sm:$0xff]  ;;  %v180_v19 = vld [vmem:[#allocation8 + $0x40] sm:$0xff]  ;;  %v179_v21 = vld [vmem:[#allocation8 + $0x38] sm:$0xff] }
  0x2c   :  { %345 = vmatprep.subr.mxu0 %v82_v3  ;;  %377 = vmatpush3.msra.mxu1 %v186_v7  ;;  %v75_v18 = vld [vmem:[#allocation6 + $0x28] sm:$0xff]  ;;  %v74_v20 = vld [vmem:[#allocation6 + $0x20] sm:$0xff]  ;;  %v73_v22 = vld [vmem:[#allocation6 + $0x18] sm:$0xff] }
  0x2d   :  { %346 = vmatpush3.msra.mxu0 %v82_v3  ;;  %378 = vmatprep.subr.mxu1 %v185_v9  ;;  %v178_v23 = vld [vmem:[#allocation8 + $0x30] sm:$0xff]  ;;  %v177_v25 = vld [vmem:[#allocation8 + $0x28] sm:$0xff]  ;;  %v176_v27 = vld [vmem:[#allocation8 + $0x20] sm:$0xff] }
  0x2e   :  { %347 = vmatprep.subr.mxu0 %v81_v5  ;;  %379 = vmatpush3.msra.mxu1 %v185_v9  ;;  %v72_v24 = vld [vmem:[#allocation6 + $0x10] sm:$0xff]  ;;  %v71_v26 = vld [vmem:[#allocation6 + $0x8] sm:$0xff]  ;;  %v70_v28 = vld [vmem:[#allocation6] sm:$0xff] }
  0x2f   :  { %348 = vmatpush3.msra.mxu0 %v81_v5  ;;  %380 = vmatprep.subr.mxu1 %v184_v11  ;;  %v69_v29 = vld [vmem:[#allocation3 + $0x8] sm:$0xff]  ;;  %v174_v31 = vld [vmem:[#allocation8 + $0x10] sm:$0xff]  ;;  %v173_v32 = vld [vmem:[#allocation8 + $0x8] sm:$0xff] }
  0x30   :  { %349 = vmatprep.subr.mxu0 %v80_v8  ;;  %381 = vmatpush3.msra.mxu1 %v184_v11  ;;  %v175_v30 = vld [vmem:[#allocation8 + $0x18] sm:$0xff]  ;;  %v172_v33 = vld [vmem:[#allocation8] sm:$0xff]  ;;  %v301_v34 = vld [vmem:[%s569_s2] ss:$0 sm:$0xff]  ;;  %s475_s2 = scalar_lea.vmem %s289_s12, 256 }
  0x31   :  { %350 = vmatpush3.msra.mxu0 %v80_v8  ;;  %382 = vmatprep.subr.mxu1 %v183_v13  ;;  %v302_v41 = vld [vmem:[%s571_s4] ss:$0 sm:$0xff]  ;;  %p476_p1 = scmp.ne.s32.totalorder %s289_s12, %s475_s2  ;;  %p481_p3 = scmp.lt.s32.totalorder %s475_s2, %s475_s2 }
  0x32   :  { %351 = vmatprep.subr.mxu0 %v79_v10  ;;  %383 = vmatpush3.msra.mxu1 %v183_v13 }
  0x33   :  { %352 = vmatpush3.msra.mxu0 %v79_v10  ;;  %384 = vmatprep.subr.mxu1 %v182_v15  ;;  %p482_p4 = por %p481_p3, %p480_p2 }
  0x34   :  { %353 = vmatprep.subr.mxu0 %v78_v12  ;;  %385 = vmatpush3.msra.mxu1 %v182_v15 }
  0x35   :  { %354 = vmatpush3.msra.mxu0 %v78_v12  ;;  %386 = vmatprep.subr.mxu1 %v181_v17  ;;  %p483_p5 = pnand %p482_p4, %p476_p1 }
  0x36   :  { %355 = vmatprep.subr.mxu0 %v77_v14  ;;  %387 = vmatpush3.msra.mxu1 %v181_v17 }
  0x37   :  { %356 = vmatpush3.msra.mxu0 %v77_v14  ;;  %388 = vmatprep.subr.mxu1 %v180_v19 }
  0x38   :  { %357 = vmatprep.subr.mxu0 %v76_v16  ;;  %389 = vmatpush3.msra.mxu1 %v180_v19 }
  0x39   :  { %358 = vmatpush3.msra.mxu0 %v76_v16  ;;  %390 = vmatprep.subr.mxu1 %v179_v21 }
  0x3a   :  { %359 = vmatprep.subr.mxu0 %v75_v18  ;;  %391 = vmatpush3.msra.mxu1 %v179_v21 }
  0x3b   :  { %360 = vmatpush3.msra.mxu0 %v75_v18  ;;  %392 = vmatprep.subr.mxu1 %v178_v23 }
  0x3c   :  { %361 = vmatprep.subr.mxu0 %v74_v20  ;;  %393 = vmatpush3.msra.mxu1 %v178_v23 }
  0x3d   :  { %362 = vmatpush3.msra.mxu0 %v74_v20  ;;  %394 = vmatprep.subr.mxu1 %v177_v25 }
  0x3e   :  { %363 = vmatprep.subr.mxu0 %v73_v22  ;;  %395 = vmatpush3.msra.mxu1 %v177_v25 }
  0x3f   :  { %364 = vmatpush3.msra.mxu0 %v73_v22  ;;  %396 = vmatprep.subr.mxu1 %v176_v27 }
  0x40   :  { %365 = vmatprep.subr.mxu0 %v72_v24  ;;  %397 = vmatpush3.msra.mxu1 %v176_v27 }
  0x41   :  { %366 = vmatpush3.msra.mxu0 %v72_v24  ;;  %398 = vmatprep.subr.mxu1 %v175_v30 }
  0x42   :  { %367 = vmatprep.subr.mxu0 %v71_v26  ;;  %399 = vmatpush3.msra.mxu1 %v175_v30 }
  0x43   :  { %368 = vmatpush3.msra.mxu0 %v71_v26  ;;  %400 = vmatprep.subr.mxu1 %v174_v31 }
  0x44   :  { %369 = vmatprep.subr.mxu0 %v70_v28  ;;  %401 = vmatpush3.msra.mxu1 %v174_v31 }
  0x45   :  { %370 = vmatpush3.msra.mxu0 %v70_v28  ;;  %402 = vmatprep.subr.mxu1 %v173_v32 }
  0x46   :  { %372 = vmatmul.mubr.f32.vlgmr.msra.gmra.mxu0 %v69_v29  ;;  %403 = vmatpush3.msra.mxu1 %v173_v32 }
  0x47   :  { %404 = vmatprep.subr.mxu1 %v172_v33 }
  0x48   :  { %405 = vmatpush3.msra.mxu1 %v172_v33 }
 0x106   :  { %v373_v35 = vpop.f32.mrf.mxu0 }
 0x107   :  { %v165_v36 = vadd.f32 %v373_v35, %v301_v34 }
 0x108   :  { %v159_v37 = vpop.f32.mrf.mxu0 }
 0x109   :  { %v160_v38 = vadd.f32 %v301_v34, %v159_v37  ;;  %v169_v40 = vmax.f32 %v165_v36, 0.0 }
 0x10b   :  { %v168_v39 = vmax.f32 %v160_v38, 0.0 }
 0x10d   :  { %406 = vmatprep.mubr.f32.mxu1 %v168_v39 }
 0x10e   :  { %407 = vmatmul.mubr.f32.vlgmr.msra.gmra.mxu1 %v169_v40 }
 0x1ce   :  { %v408_v42 = vpop.f32.mrf.mxu1 }
 0x1cf   :  { %v280_v43 = vadd.f32 %v408_v42, %v302_v41 }
 0x1d0   :  { %v254_v44 = vpop.f32.mrf.mxu1 }
 0x1d1   :  { %282 = vst [vmem:[#allocation9 + $0x8] sm:$0xff] %v280_v43  ;;  %v279_v45 = vadd.f32 %v302_v41, %v254_v44 }
 0x1d3   :  { %281 = vst [vmem:[#allocation9] sm:$0xff] %v279_v45 }
 0x1d4   :  { %486 = shalt.err (!%p483_p5)
}
 0x1d5   :  { %294 = dma.vmem_to_hbm [thread:$0]  %s289_s12, 256, %s572_s5, [#allocation5], %s503_s23, %s503_s23, %s504_s24  }
 0x1d6   :  { %499 = dma.done.wait [#allocation5], 256  }
 0x1d7   :  { %500 = vsyncadd [#allocation5], 4294967040 }
 0x1d8   :  { %298 = vsyncpa [#allocation4], 1 }
 0x1d9   :  { %299 = vsyncpa [#allocation7], 1 }
 0x1da   :  { %300 = vsyncpa [#allocation5], 1 }

</bundles_post_ra>
